<compile_context>
chip_gen: v5e
topology: v5e:2x2
jax: 0.10.0
libtpu: 0.0.40
codegen_flags: <defaults>
</compile_context>

<pallas_src>
import functools

import jax
import jax.numpy as jnp
from jax.experimental import pallas as pl
from jax.experimental.pallas import tpu as pltpu

_LANE = 128
_SUBLANE = 8
_FUSED_VMEM_GATE = 40 * 1024 * 1024     # take the fused path only if it fits
_FUSED_VMEM_LIMIT = 48 * 1024 * 1024    # <= v7x 64 MiB physical VMEM


def _round_up(x, m):
    return (x + m - 1) // m * m


# ---------------------------------------------------------------------------
# Kernels
# ---------------------------------------------------------------------------
def _chain_kernel(*refs, num_layers):
    """Fused layer chain. refs = (x, w0, p0, ..., w_{L-1}, p_{L-1}, out).

    p_l rows: 0 = bias, 1 = bn_scale, 2 = bn_shift (all f32, lane-padded).
    Intermediate activations live in VMEM/vregs (compiler-managed) — no HBM
    round-trip between layers.
    """
    x_ref = refs[0]
    o_ref = refs[1 + 2 * num_layers]
    h = x_ref[...]                                          # (tm, F0) bf16
    for l in range(num_layers):
        w_ref = refs[1 + 2 * l]
        p_ref = refs[2 + 2 * l]
        z = jnp.dot(h.astype(w_ref.dtype), w_ref[...],
                    preferred_element_type=jnp.float32)     # MXU bf16, f32 acc
        b = p_ref[0:1, :]
        scale = p_ref[1:2, :]
        shift = p_ref[2:3, :]
        h = jnp.maximum(z + b, 0.0) * scale + shift         # VPU epilogue, f32
    o_ref[...] = h.astype(o_ref.dtype)


def _layer_tiled_kernel(x_ref, w_ref, p_ref, o_ref, acc_ref):
    """One layer, (M, N, K)-tiled: f32 accumulator scratch, epilogue on last K."""
    k = pl.program_id(2)

    @pl.when(k == 0)
    def _():
        acc_ref[...] = jnp.zeros_like(acc_ref)

    acc_ref[...] += jnp.dot(x_ref[...].astype(w_ref.dtype), w_ref[...],
                            preferred_element_type=jnp.float32)

    @pl.when(k == pl.num_programs(2) - 1)
    def _():
        b = p_ref[0:1, :]
        scale = p_ref[1:2, :]
        shift = p_ref[2:3, :]
        o_ref[...] = (jnp.maximum(acc_ref[...] + b, 0.0) * scale
                      + shift).astype(o_ref.dtype)


# ---------------------------------------------------------------------------
# pallas_call wrappers
# ---------------------------------------------------------------------------
def _fused_chain(x_p, ws, ps, tm):
    b_pad, fin_p = x_p.shape
    fout_p = ws[-1].shape[1]
    num_layers = len(ws)

    in_specs = [pl.BlockSpec((tm, fin_p), lambda i: (i, 0))]
    flat_args = []
    for w, p in zip(ws, ps):
        # Constant index_map -> weights/params resident in VMEM across the grid.
        in_specs.append(pl.BlockSpec(w.shape, lambda i: (0, 0)))
        in_specs.append(pl.BlockSpec(p.shape, lambda i: (0, 0)))
        flat_args.extend([w, p])

    kernel = functools.partial(_chain_kernel, num_layers=num_layers)
    return pl.pallas_call(
        kernel,
        out_shape=jax.ShapeDtypeStruct((b_pad, fout_p), jnp.float32),
        grid=(b_pad // tm,),
        in_specs=in_specs,
        out_specs=pl.BlockSpec((tm, fout_p), lambda i: (i, 0)),
        compiler_params=pltpu.CompilerParams(
            dimension_semantics=("parallel",),
            vmem_limit_bytes=_FUSED_VMEM_LIMIT),
    )(x_p, *flat_args)


def _pick_tile(dim_p):
    if dim_p % 512 == 0:
        return 512
    if dim_p % 256 == 0:
        return 256
    return 128


def _layer_tiled(x_p, w, p, tm, out_dtype):
    b_pad, fin_p = x_p.shape
    fout_p = w.shape[1]
    tk = min(_pick_tile(fin_p), fin_p)
    tn = min(_pick_tile(fout_p), fout_p)
    grid = (b_pad // tm, fout_p // tn, fin_p // tk)
    return pl.pallas_call(
        _layer_tiled_kernel,
        out_shape=jax.ShapeDtypeStruct((b_pad, fout_p), out_dtype),
        grid=grid,
        in_specs=[
            pl.BlockSpec((tm, tk), lambda i, j, k: (i, k)),
            pl.BlockSpec((tk, tn), lambda i, j, k: (k, j)),
            pl.BlockSpec((3, tn), lambda i, j, k: (0, j)),
        ],
        out_specs=pl.BlockSpec((tm, tn), lambda i, j, k: (i, j)),
        scratch_shapes=[pltpu.VMEM((tm, tn), jnp.float32)],
        compiler_params=pltpu.CompilerParams(
            dimension_semantics=("parallel", "parallel", "arbitrary")),
    )(x_p, w, p)


def _vmem_required(ws, ps, tm, fin_p, fout_p):
    """Rough fused-chain VMEM estimate: double-buffered weights/params + x/out
    tiles + headroom for intermediate activation vregs/VMEM temporaries."""
    w_bytes = sum(w.size * w.dtype.itemsize for w in ws)
    p_bytes = sum(p.size * 4 for p in ps)
    max_feat = max(w.shape[1] for w in ws)
    act_bytes = 4 * tm * max_feat * 4
    io_bytes = 2 * tm * fin_p * 2 + 2 * tm * fout_p * 4
    return 2 * (w_bytes + p_bytes) + act_bytes + io_bytes


# ---------------------------------------------------------------------------
# Parameters (mirroring the PyTorch module) and forward
# ---------------------------------------------------------------------------
def make_dense_control_block_params(key, input_dim, num_layer, scale=2,
                                    scale_type="exp"):
    """Deterministic f32 params mirroring the PyTorch module (eval mode)."""
    if scale_type == "exp":
        dims = [input_dim * scale ** i for i in range(num_layer)]
    elif scale_type == "mul":
        dims = [input_dim + input_dim * (scale * i) for i in range(num_layer)]
    else:
        raise ValueError(scale_type)

    params = []
    eps = 1e-5
    for i, (fin, fout) in enumerate(zip(dims[:-1], dims[1:])):
        key, kw, kb, kg, kbeta = jax.random.split(key, 5)
        bound = 1.0 / float(fin) ** 0.5
        # PyTorch Linear stores weight as (out, in); we keep (in, out) layout.
        w = jax.random.uniform(kw, (fin, fout), jnp.float32, -bound, bound)
        b = jax.random.uniform(kb, (fout,), jnp.float32, -bound, bound)
        if i != 0:
            # TODO(synk): Dropout is identity in eval mode; train-mode masking
            # and train-mode BatchNorm batch statistics are not implemented.
            gamma = 1.0 + 0.1 * jax.random.normal(kg, (fout,), jnp.float32)
            beta = 0.1 * jax.random.normal(kbeta, (fout,), jnp.float32)
            running_mean = jnp.zeros((fout,), jnp.float32)
            running_var = jnp.ones((fout,), jnp.float32)
            bn_scale = gamma / jnp.sqrt(running_var + eps)
            bn_shift = beta - running_mean * bn_scale
        else:
            bn_scale = jnp.ones((fout,), jnp.float32)
            bn_shift = jnp.zeros((fout,), jnp.float32)
        params.append((w, b, bn_scale, bn_shift))
    return params, dims


def prepare_params(params, dims, weight_dtype=jnp.bfloat16):
    """Zero-pad feature dims to multiples of 128 (lane-dense), cast weights to
    bf16 for the MXU and pack (bias, bn_scale, bn_shift) into one (3, Fout)
    f32 array per layer.  Padding never leaks: padded output columns have
    b = scale = shift = 0, so relu(0)*0 + 0 = 0 feeds the next layer."""
    dims_pad = [_round_up(d, _LANE) for d in dims]
    ws, ps = [], []
    for l, (w, b, bn_scale, bn_shift) in enumerate(params):
        fin, fout = w.shape
        fin_p, fout_p = dims_pad[l], dims_pad[l + 1]
        w_p = jnp.zeros((fin_p, fout_p), jnp.float32).at[:fin, :fout].set(w)
        ws.append(w_p.astype(weight_dtype))
        p_p = jnp.zeros((3, fout_p), jnp.float32)
        p_p = p_p.at[0, :fout].set(b)
        p_p = p_p.at[1, :fout].set(bn_scale)
        p_p = p_p.at[2, :fout].set(bn_shift)
        ps.append(p_p)
    return ws, ps


@functools.partial(jax.jit, static_argnames=("out_dim", "force_layerwise"))
def dense_control_block_forward(x, ws, ps, out_dim, force_layerwise=False):
    B, fin = x.shape
    fin_p = ws[0].shape[0]
    fout_p = ws[-1].shape[1]

    # Batch tile: sublane-aligned; grow to 256/512 if the batch is large and
    # the fully-resident fused plan still fits the VMEM budget.
    if B >= _LANE:
        tm = _LANE
        for cand in (512, 256):
            if (B >= cand and
                    _vmem_required(ws, ps, cand, fin_p, fout_p) <= _FUSED_VMEM_GATE):
                tm = cand
                break
    else:
        tm = _round_up(max(B, 1), _SUBLANE)
    b_pad = _round_up(B, tm)

    # Pre-cast x to bf16 (it is cast before the MXU anyway): halves input DMA.
    x_p = jnp.zeros((b_pad, fin_p), jnp.bfloat16).at[:B, :fin].set(
        x.astype(jnp.bfloat16))

    required = _vmem_required(ws, ps, tm, fin_p, fout_p)

    if force_layerwise or required > _FUSED_VMEM_GATE:
        # TODO(synk): stream only the largest (last) weight via manual DMA and
        # keep the small early-layer weights resident, instead of falling back
        # to fully layer-wise execution.
        h = x_p
        for l, (w, p) in enumerate(zip(ws, ps)):
            last = l == len(ws) - 1
            # bf16 intermediates (next matmul consumes bf16 anyway) -> half the
            # HBM round-trip traffic; final layer kept in f32.
            h = _layer_tiled(h, w, p, tm,
                             jnp.float32 if last else jnp.bfloat16)
        y_p = h
    else:
        y_p = _fused_chain(x_p, ws, ps, tm)

    return y_p[:B, :out_dim]


# ---------------------------------------------------------------------------
# References
# ---------------------------------------------------------------------------
def _reference_forward_f32(x, params):
    """Plain f32 JAX reference with the module's eval-mode semantics."""
    for (w, b, bn_scale, bn_shift) in params:
        x = jnp.maximum(x @ w + b, 0.0) * bn_scale + bn_shift
    return x


def _reference_forward_matched(x, ws, ps, out_dim):
    """Reference with the same padded/bf16 arithmetic the kernels use."""
    B, fin = x.shape
    fin_p = ws[0].shape[0]
    h = jnp.zeros((B, fin_p), jnp.float32).at[:, :fin].set(x)
    for w, p in zip(ws, ps):
        z = jnp.dot(h.astype(w.dtype), w, preferred_element_type=jnp.float32)
        h = jnp.maximum(z + p[0:1], 0.0) * p[1:2] + p[2:3]
    return h[:, :out_dim]


if __name__ == "__main__":
    key = jax.random.PRNGKey(0)
    kx, kp = jax.random.split(key)

    batch = 8
    input_dim = 32
    num_layer = 3  # dims = [32, 64, 128]; layers: 32->64 (no BN), 64->128 (BN)

    params, dims = make_dense_control_block_params(kp, input_dim, num_layer)
    ws, ps = prepare_params(params, dims)
    x = jax.random.normal(kx, (batch, input_dim), jnp.float32)

    # Fused-chain path (single pallas_call, weights resident in VMEM).
    out_fused = dense_control_block_forward(x, ws, ps, out_dim=dims[-1])
    out_fused = jax.block_until_ready(out_fused)

    # Per-layer tiled fallback path (exercised for coverage).
    out_layer = dense_control_block_forward(x, ws, ps, out_dim=dims[-1],
                                            force_layerwise=True)
    out_layer = jax.block_until_ready(out_layer)

    ref_match = _reference_forward_matched(x, ws, ps, dims[-1])
    ref_f32 = _reference_forward_f32(x, params)

    assert out_fused.shape == (batch, dims[-1]), out_fused.shape
    assert out_layer.shape == (batch, dims[-1]), out_layer.shape
    # Exact-arithmetic match (same bf16 weights/activations, f32 accumulation).
    assert jnp.allclose(out_fused, ref_match, atol=1e-3, rtol=1e-3), \
        "fused kernel mismatch vs bf16-matched reference"
    assert jnp.allclose(out_layer, ref_match, atol=1e-3, rtol=1e-3), \
        "layer-tiled kernel mismatch vs bf16-matched reference"
    # Module-semantics match (f32 reference, bf16 quantization tolerance).
    assert jnp.allclose(out_fused, ref_f32, atol=5e-2, rtol=5e-2), \
        "fused kernel mismatch vs f32 module reference"

    print("KERNEL_OK")
</pallas_src>

<mosaic_0001>
module attributes {stable_mosaic.version = 11 : i64} {
  func.func @_chain_kernel(%arg0: i32, %arg1: memref<8x128xbf16, #tpu.memory_space<vmem>>, %arg2: memref<128x128xbf16, #tpu.memory_space<vmem>>, %arg3: memref<3x128xf32, #tpu.memory_space<vmem>>, %arg4: memref<128x128xbf16, #tpu.memory_space<vmem>>, %arg5: memref<3x128xf32, #tpu.memory_space<vmem>>, %arg6: memref<8x128xf32, #tpu.memory_space<vmem>>) attributes {dimension_semantics = [#tpu.dimension_semantics<parallel>], iteration_bounds = array<i64: 1>, scalar_prefetch = 0 : i64, scratch_operands = 0 : i64, tpu.core_type = #tpu.core_type<tc>, window_params = [{transform_indices = @transform_0, window_bounds = array<i64: 8, 128>}, {pipeline_mode = #tpu.pipeline_mode<synchronous>, transform_indices = @transform_1, window_bounds = array<i64: 128, 128>}, {pipeline_mode = #tpu.pipeline_mode<synchronous>, transform_indices = @transform_2, window_bounds = array<i64: 3, 128>}, {pipeline_mode = #tpu.pipeline_mode<synchronous>, transform_indices = @transform_3, window_bounds = array<i64: 128, 128>}, {pipeline_mode = #tpu.pipeline_mode<synchronous>, transform_indices = @transform_4, window_bounds = array<i64: 3, 128>}, {transform_indices = @transform_5, window_bounds = array<i64: 8, 128>}]} {
    %c0 = arith.constant 0 : index
    %c0_0 = arith.constant 0 : index
    %0 = vector.load %arg1[%c0, %c0_0] : memref<8x128xbf16, #tpu.memory_space<vmem>>, vector<8x128xbf16>
    %c0_1 = arith.constant 0 : index
    %c0_2 = arith.constant 0 : index
    %1 = vector.load %arg2[%c0_1, %c0_2] : memref<128x128xbf16, #tpu.memory_space<vmem>>, vector<128x128xbf16>
    %cst = arith.constant dense<0.000000e+00> : vector<8x128xf32>
    %2 = tpu.matmul %0, %1, %cst {dimension_numbers = #tpu.dot_dimension_numbers<[1], [0], [0], [1], [0, 0, 1, 1], [], []>} : vector<8x128xbf16>, vector<128x128xbf16>, vector<8x128xf32> -> vector<8x128xf32>
    %c0_3 = arith.constant 0 : index
    %c0_4 = arith.constant 0 : index
    %3 = vector.load %arg3[%c0_3, %c0_4] : memref<3x128xf32, #tpu.memory_space<vmem>>, vector<1x128xf32>
    %c1 = arith.constant 1 : index
    %c0_5 = arith.constant 0 : index
    %4 = vector.load %arg3[%c1, %c0_5] : memref<3x128xf32, #tpu.memory_space<vmem>>, vector<1x128xf32>
    %c2 = arith.constant 2 : index
    %c0_6 = arith.constant 0 : index
    %5 = vector.load %arg3[%c2, %c0_6] : memref<3x128xf32, #tpu.memory_space<vmem>>, vector<1x128xf32>
    %6 = vector.broadcast %3 : vector<1x128xf32> to vector<8x128xf32>
    %7 = arith.addf %2, %6 : vector<8x128xf32>
    %cst_7 = arith.constant 0.000000e+00 : f32
    %8 = vector.broadcast %cst_7 : f32 to vector<8x128xf32>
    %9 = arith.maximumf %7, %8 : vector<8x128xf32>
    %10 = vector.broadcast %4 : vector<1x128xf32> to vector<8x128xf32>
    %11 = arith.mulf %9, %10 : vector<8x128xf32>
    %12 = vector.broadcast %5 : vector<1x128xf32> to vector<8x128xf32>
    %13 = arith.addf %11, %12 : vector<8x128xf32>
    %14 = arith.truncf %13 : vector<8x128xf32> to vector<8x128xbf16>
    %c0_8 = arith.constant 0 : index
    %c0_9 = arith.constant 0 : index
    %15 = vector.load %arg4[%c0_8, %c0_9] : memref<128x128xbf16, #tpu.memory_space<vmem>>, vector<128x128xbf16>
    %cst_10 = arith.constant dense<0.000000e+00> : vector<8x128xf32>
    %16 = tpu.matmul %14, %15, %cst_10 {dimension_numbers = #tpu.dot_dimension_numbers<[1], [0], [0], [1], [0, 0, 1, 1], [], []>} : vector<8x128xbf16>, vector<128x128xbf16>, vector<8x128xf32> -> vector<8x128xf32>
    %c0_11 = arith.constant 0 : index
    %c0_12 = arith.constant 0 : index
    %17 = vector.load %arg5[%c0_11, %c0_12] : memref<3x128xf32, #tpu.memory_space<vmem>>, vector<1x128xf32>
    %c1_13 = arith.constant 1 : index
    %c0_14 = arith.constant 0 : index
    %18 = vector.load %arg5[%c1_13, %c0_14] : memref<3x128xf32, #tpu.memory_space<vmem>>, vector<1x128xf32>
    %c2_15 = arith.constant 2 : index
    %c0_16 = arith.constant 0 : index
    %19 = vector.load %arg5[%c2_15, %c0_16] : memref<3x128xf32, #tpu.memory_space<vmem>>, vector<1x128xf32>
    %20 = vector.broadcast %17 : vector<1x128xf32> to vector<8x128xf32>
    %21 = arith.addf %16, %20 : vector<8x128xf32>
    %cst_17 = arith.constant 0.000000e+00 : f32
    %22 = vector.broadcast %cst_17 : f32 to vector<8x128xf32>
    %23 = arith.maximumf %21, %22 : vector<8x128xf32>
    %24 = vector.broadcast %18 : vector<1x128xf32> to vector<8x128xf32>
    %25 = arith.mulf %23, %24 : vector<8x128xf32>
    %26 = vector.broadcast %19 : vector<1x128xf32> to vector<8x128xf32>
    %27 = arith.addf %25, %26 : vector<8x128xf32>
    %c0_18 = arith.constant 0 : index
    %c0_19 = arith.constant 0 : index
    %28 = vector.load %arg6[%c0_18, %c0_19] : memref<8x128xf32, #tpu.memory_space<vmem>>, vector<8x128xf32>
    tpu.vector_store %arg6[%c0_18, %c0_19], %27 {strides = array<i32>} : memref<8x128xf32, #tpu.memory_space<vmem>>, vector<8x128xf32>,
    return
  }
  func.func @transform_0(%arg0: i32) -> (i32, i32) {
    %c0_i32 = arith.constant 0 : i32
    %c0_i32_0 = arith.constant 0 : i32
    return %arg0, %c0_i32 : i32, i32
  }
  func.func @transform_1(%arg0: i32) -> (i32, i32) {
    %c0_i32 = arith.constant 0 : i32
    %c0_i32_0 = arith.constant 0 : i32
    %c0_i32_1 = arith.constant 0 : i32
    return %c0_i32, %c0_i32_0 : i32, i32
  }
  func.func @transform_2(%arg0: i32) -> (i32, i32) {
    %c0_i32 = arith.constant 0 : i32
    %c0_i32_0 = arith.constant 0 : i32
    %c0_i32_1 = arith.constant 0 : i32
    return %c0_i32, %c0_i32_0 : i32, i32
  }
  func.func @transform_3(%arg0: i32) -> (i32, i32) {
    %c0_i32 = arith.constant 0 : i32
    %c0_i32_0 = arith.constant 0 : i32
    %c0_i32_1 = arith.constant 0 : i32
    return %c0_i32, %c0_i32_0 : i32, i32
  }
  func.func @transform_4(%arg0: i32) -> (i32, i32) {
    %c0_i32 = arith.constant 0 : i32
    %c0_i32_0 = arith.constant 0 : i32
    %c0_i32_1 = arith.constant 0 : i32
    return %c0_i32, %c0_i32_0 : i32, i32
  }
  func.func @transform_5(%arg0: i32) -> (i32, i32) {
    %c0_i32 = arith.constant 0 : i32
    %c0_i32_0 = arith.constant 0 : i32
    return %arg0, %c0_i32 : i32, i32
  }
}

</mosaic_0001>

<bundles_post_ra>
// kernel: dense_control_block_forward.1
= control target key start
LH: loop header
LB: loop body
LE: loop exit
PB: predicated region body
PF: predicated region fallthrough
CT: control target
= control target key end

     0   :  { %10 = vsyncpa [#allocation3], 0  ;;  %s480_s0 = inlined_call_operand.vmem [shape: bf16[8,128], index: 0, kind: input, shape index: {}]   ;;  %s481_s1 = inlined_call_operand.hbm [shape: bf16[128,128], index: 1, kind: input, shape index: {}]   ;;  %s482_s2 = inlined_call_operand.vmem [shape: f32[3,128], index: 2, kind: input, shape index: {}]   ;;  %s483_s3 = inlined_call_operand.hbm [shape: bf16[128,128], index: 3, kind: input, shape index: {}]   ;;  %s484_s4 = inlined_call_operand.vmem [shape: f32[3,128], index: 4, kind: input, shape index: {}]   ;;  %s485_s5 = inlined_call_operand.hbm [shape: f32[8,128], index: 5, kind: output, shape index: {}]  }
   0x1   :  { %11 = vsyncpa [#allocation6], 0 }
   0x2   :  { %12 = vsyncpa [#allocation4], 0  ;;  %s19_s20 = sshll.u32 %s481_s1, 4  ;;  %s415_s21 = smov [#allocation2]   ;;  %s20_s20 = int_to_ptr.hbm [resolvable:$true] %s19_s20 }
   0x3   :  { %s21_s22 = sshll.u32 %s415_s21, 4  ;;  %s34_s25 = sshll.u32 %s483_s3, 4  ;;  %s22_s22 = int_to_ptr.vmem [resolvable:$true] %s21_s22  ;;  %s35_s25 = int_to_ptr.hbm [resolvable:$true] %s34_s25 }
   0x4   :  { %s416_s26 = smov 64   ;;  %s417_s27 = smov 4  }
   0x5   :  { %27 = dma.hbm_to_vmem [thread:$0]  %s20_s20, 1024, %s22_s22, [#allocation3], %s416_s26, %s416_s26, %s417_s27  }
   0x6   :  { %s418_s28 = smov [#allocation5]  }
   0x7   :  { %s36_s29 = sshll.u32 %s418_s28, 4  ;;  %s37_s29 = int_to_ptr.vmem [resolvable:$true] %s36_s29 }
   0x8   :  { %42 = dma.hbm_to_vmem [thread:$0]  %s35_s25, 1024, %s37_s29, [#allocation6], %s416_s26, %s416_s26, %s417_s27  }
   0x9   :  { %409 = dma.done.wait [#allocation3], 1024  }
   0xa   :  { %410 = vsyncadd [#allocation3], 4294966272 }
   0xb   :  { %411 = dma.done.wait [#allocation6], 1024  }
   0xc   :  { %412 = vsyncadd [#allocation6], 4294966272  ;;  %v317_v0 = vld [vmem:[#allocation2 + $0x38] sm:$0xff]  ;;  %v316_v1 = vld [vmem:[#allocation2 + $0x30] sm:$0xff]  ;;  %s235_s19 = sshll.u32 %s485_s5, 4  ;;  %s236_s19 = int_to_ptr.hbm [resolvable:$true] %s235_s19 }
   0xd   :  { %122 = vmatpush.bf16.msra.mxu0 %v317_v0  ;;  %v325_v2 = vld [vmem:[#allocation5 + $0x38] sm:$0xff]  ;;  %v315_v3 = vld [vmem:[#allocation2 + $0x28] sm:$0xff]  ;;  %v324_v4 = vld [vmem:[#allocation5 + $0x30] sm:$0xff] }
   0xe   :  { %209 = vmatpush.bf16.msra.mxu1 %v325_v2  ;;  %v323_v5 = vld [vmem:[#allocation5 + $0x28] sm:$0xff]  ;;  %v314_v6 = vld [vmem:[#allocation2 + $0x20] sm:$0xff]  ;;  %v313_v8 = vld [vmem:[#allocation2 + $0x18] sm:$0xff] }
   0xf   :  { %v322_v7 = vld [vmem:[#allocation5 + $0x20] sm:$0xff]  ;;  %v321_v9 = vld [vmem:[#allocation5 + $0x18] sm:$0xff]  ;;  %v312_v10 = vld [vmem:[#allocation2 + $0x10] sm:$0xff] }
  0x10   :  { %v311_v11 = vld [vmem:[#allocation2 + $0x8] sm:$0xff]  ;;  %v310_v12 = vld [vmem:[#allocation2] sm:$0xff]  ;;  %v320_v14 = vld [vmem:[#allocation5 + $0x10] sm:$0xff] }
  0x11   :  { %123 = vmatpush.bf16.msra.mxu0 %v316_v1  ;;  %v53_v13 = vld [vmem:[%s480_s0] sm:$0xf]  ;;  %v319_v15 = vld [vmem:[#allocation5 + $0x8] sm:$0xff] }
  0x12   :  { %210 = vmatpush.bf16.msra.mxu1 %v324_v4  ;;  %v318_v16 = vld [vmem:[#allocation5] sm:$0xff] }
  0x13   :  { %v331_v17 = vld [vmem:[%s482_s2] ss:$0 sm:$0xff]  ;;  %v332_v20 = vld [vmem:[%s482_s2 + $0x1] ss:$0 sm:$0xff]  ;;  %v333_v22 = vld [vmem:[%s482_s2 + $0x2] ss:$0 sm:$0xff] }
  0x14   :  { %v334_v27 = vld [vmem:[%s484_s4] ss:$0 sm:$0xff]  ;;  %v335_v30 = vld [vmem:[%s484_s4 + $0x1] ss:$0 sm:$0xff]  ;;  %v336_v32 = vld [vmem:[%s484_s4 + $0x2] ss:$0 sm:$0xff] }
  0x15   :  { %124 = vmatpush.bf16.msra.mxu0 %v315_v3  ;;  %s419_s2 = smov [#allocation7]  }
  0x16   :  { %211 = vmatpush.bf16.msra.mxu1 %v323_v5  ;;  %s233_s16 = sshll.u32 %s419_s2, 4  ;;  %s234_s16 = int_to_ptr.vmem [resolvable:$true] %s233_s16 }
  0x19   :  { %125 = vmatpush.bf16.msra.mxu0 %v314_v6 }
  0x1a   :  { %212 = vmatpush.bf16.msra.mxu1 %v322_v7 }
  0x1d   :  { %126 = vmatpush.bf16.msra.mxu0 %v313_v8 }
  0x1e   :  { %213 = vmatpush.bf16.msra.mxu1 %v321_v9 }
  0x21   :  { %127 = vmatpush.bf16.msra.mxu0 %v312_v10 }
  0x22   :  { %214 = vmatpush.bf16.msra.mxu1 %v320_v14 }
  0x25   :  { %128 = vmatpush.bf16.msra.mxu0 %v311_v11 }
  0x26   :  { %215 = vmatpush.bf16.msra.mxu1 %v319_v15 }
  0x29   :  { %129 = vmatpush.bf16.msra.mxu0 %v310_v12 }
  0x2a   :  { %216 = vmatpush.bf16.msra.mxu1 %v318_v16 }
  0x2c   :  { %130 = vmatmul.bf16.vlgmr.msra.gmra.mxu0 %v53_v13 }
  0xa9   :  { %v131_v18 = vpop.f32.mrf.mxu0 }
  0xaa   :  { %v132_v19 = vadd.f32 %v331_v17, %v131_v18 }
  0xac   :  { %v135_v21 = vmax.f32 %v132_v19, 0.0 }
  0xae   :  { %v137_v23 = vmul.f32 %v332_v20, %v135_v21 }
  0xb0   :  { %v139_v24 = vadd.f32 %v333_v22, %v137_v23 }
  0xb1   :  { %v133_v25 = vpop.f32.mrf.mxu0 }
  0xb2   :  { %v140_v26 = vpack.c.bf16 %v139_v24, %v139_v24 }
  0xb4   :  { %217 = vmatmul.bf16.vlgmr.msra.gmra.mxu1 %v140_v26 }
 0x131   :  { %v218_v28 = vpop.f32.mrf.mxu1 }
 0x132   :  { %v219_v29 = vadd.f32 %v334_v27, %v218_v28 }
 0x134   :  { %v222_v31 = vmax.f32 %v219_v29, 0.0 }
 0x136   :  { %v224_v33 = vmul.f32 %v335_v30, %v222_v31 }
 0x138   :  { %v226_v34 = vadd.f32 %v336_v32, %v224_v33 }
 0x139   :  { %v220_v35 = vpop.f32.mrf.mxu1 }
 0x13a   :  { %227 = vst [vmem:[#allocation7] sm:$0xff] %v226_v34 }
 0x13b   :  { %238 = dma.vmem_to_hbm [thread:$0]  %s234_s16, 128, %s236_s19, [#allocation4]  }
 0x13c   :  { %413 = dma.done.wait [#allocation4], 128  }
 0x13d   :  { %414 = vsyncadd [#allocation4], 4294967168 }
 0x13e   :  { %243 = vsyncpa [#allocation3], 1 }
 0x13f   :  { %244 = vsyncpa [#allocation6], 1 }
 0x140   :  { %245 = vsyncpa [#allocation4], 1 }

</bundles_post_ra>
